<compile_context>
chip_gen: v6e
topology: v6e:2x2x1
jax: 0.10.0
libtpu: 0.0.40
codegen_flags: <defaults>
</compile_context>

<pallas_src>
import jax
import jax.numpy as jnp
from jax import lax
from jax.experimental import pallas as pl
from jax.experimental.pallas import tpu as pltpu

_EPS = 1e-8


def _force_cosine_loss_kernel(f1_ref, f2_ref, out_ref):
    # Blocks are (C, tile_n): channels on sublanes, rows on lanes.
    f1 = f1_ref[...].astype(jnp.float32)
    f2 = f2_ref[...].astype(jnp.float32)

    # Row-wise dot product and squared norms: elementwise multiplies (VPU)
    # plus a small C-sublane reduction. keepdims -> (1, tile_n), lane-dense.
    dot = jnp.sum(f1 * f2, axis=0, keepdims=True)
    w1 = jnp.sum(f1 * f1, axis=0, keepdims=True)
    w2 = jnp.sum(f2 * f2, axis=0, keepdims=True)

    # PyTorch eps semantics: clamp the *product of squared norms* at eps^2.
    eps2 = jnp.float32(_EPS * _EPS)
    cos = dot * lax.rsqrt(jnp.maximum(w1 * w2, eps2))

    out_ref[...] = (((cos - 1.0) ** 2) * 1000.0).astype(out_ref.dtype)


def force_cosine_loss(force_1, force_2, *, tile_n=16384):
    """(cosine_similarity(f1, f2, dim=1) - 1)**2 * 1000; inputs shaped (N, C)."""
    assert force_1.shape == force_2.shape and force_1.ndim == 2
    n, c = force_1.shape

    # Layout plumbing (outside the kernel): channels -> sublanes, rows -> lanes.
    f1_t = jnp.transpose(force_1)  # (C, N)
    f2_t = jnp.transpose(force_2)

    # Tile size: multiple of 128 lanes, no larger than needed for small N.
    tile_n = max(128, min(int(tile_n), pl.next_power_of_2(max(n, 1))))
    tile_n = pl.cdiv(tile_n, 128) * 128

    # Zero-pad the row dimension so N divides the tile (padded rows give a
    # finite value that is sliced away below).
    n_pad = pl.cdiv(n, tile_n) * tile_n
    if n_pad != n:
        pad = n_pad - n
        f1_t = jnp.pad(f1_t, ((0, 0), (0, pad)))
        f2_t = jnp.pad(f2_t, ((0, 0), (0, pad)))

    grid = (n_pad // tile_n,)

    out = pl.pallas_call(
        _force_cosine_loss_kernel,
        out_shape=jax.ShapeDtypeStruct((1, n_pad), jnp.float32),
        grid_spec=pltpu.PrefetchScalarGridSpec(
            num_scalar_prefetch=0,
            grid=grid,
            in_specs=[
                pl.BlockSpec((c, tile_n), lambda i: (0, i)),
                pl.BlockSpec((c, tile_n), lambda i: (0, i)),
            ],
            out_specs=pl.BlockSpec((1, tile_n), lambda i: (0, i)),
        ),
        compiler_params=pltpu.CompilerParams(
            dimension_semantics=("parallel",),
        ),
    )(f1_t, f2_t)

    # Glue: lane-dense (1, N_pad) -> (N,) to match PyTorch's output shape.
    return out[0, :n]


def _reference(force_1, force_2):
    f1 = force_1.astype(jnp.float32)
    f2 = force_2.astype(jnp.float32)
    dot = jnp.sum(f1 * f2, axis=1)
    w1 = jnp.sum(f1 * f1, axis=1)
    w2 = jnp.sum(f2 * f2, axis=1)
    cos = dot * lax.rsqrt(jnp.maximum(w1 * w2, jnp.float32(_EPS * _EPS)))
    return (cos - 1.0) ** 2 * 1000.0


if __name__ == "__main__":
    key = jax.random.PRNGKey(0)
    k1, k2 = jax.random.split(key)
    # Small shapes consistent with the module: N force vectors, 3 components.
    # N=200 deliberately exercises the non-divisible / padded-remainder path.
    N, C = 200, 3
    force_1 = jax.random.normal(k1, (N, C), dtype=jnp.float32)
    force_2 = jax.random.normal(k2, (N, C), dtype=jnp.float32)

    out = force_cosine_loss(force_1, force_2)
    jax.block_until_ready(out)

    ref = _reference(force_1, force_2)
    assert out.shape == (N,)
    assert jnp.allclose(out, ref, rtol=1e-4, atol=1e-2), (
        float(jnp.max(jnp.abs(out - ref)))
    )
    print("KERNEL_OK")
</pallas_src>

<mosaic_0001>
module attributes {stable_mosaic.version = 11 : i64} {
  func.func @_force_cosine_loss_kernel(%arg0: i32, %arg1: memref<3x256xf32, #tpu.memory_space<vmem>>, %arg2: memref<3x256xf32, #tpu.memory_space<vmem>>, %arg3: memref<1x256xf32, #tpu.memory_space<vmem>>) attributes {dimension_semantics = [#tpu.dimension_semantics<parallel>], iteration_bounds = array<i64: 1>, scalar_prefetch = 0 : i64, scratch_operands = 0 : i64, tpu.core_type = #tpu.core_type<tc>, window_params = [{transform_indices = @transform_0, window_bounds = array<i64: 3, 256>}, {transform_indices = @transform_1, window_bounds = array<i64: 3, 256>}, {transform_indices = @transform_2, window_bounds = array<i64: 1, 256>}]} {
    %c0 = arith.constant 0 : index
    %c0_0 = arith.constant 0 : index
    %0 = vector.load %arg1[%c0, %c0_0] : memref<3x256xf32, #tpu.memory_space<vmem>>, vector<3x256xf32>
    %c0_1 = arith.constant 0 : index
    %c0_2 = arith.constant 0 : index
    %1 = vector.load %arg2[%c0_1, %c0_2] : memref<3x256xf32, #tpu.memory_space<vmem>>, vector<3x256xf32>
    %2 = arith.mulf %0, %1 : vector<3x256xf32>
    %cst = arith.constant dense<0.000000e+00> : vector<256xf32>
    %3 = vector.multi_reduction <add>, %2, %cst [0] : vector<3x256xf32> to vector<256xf32>
    %4 = vector.shape_cast %3 : vector<256xf32> to vector<1x256xf32>
    %5 = arith.mulf %0, %0 : vector<3x256xf32>
    %cst_3 = arith.constant dense<0.000000e+00> : vector<256xf32>
    %6 = vector.multi_reduction <add>, %5, %cst_3 [0] : vector<3x256xf32> to vector<256xf32>
    %7 = vector.shape_cast %6 : vector<256xf32> to vector<1x256xf32>
    %8 = arith.mulf %1, %1 : vector<3x256xf32>
    %cst_4 = arith.constant dense<0.000000e+00> : vector<256xf32>
    %9 = vector.multi_reduction <add>, %8, %cst_4 [0] : vector<3x256xf32> to vector<256xf32>
    %10 = vector.shape_cast %9 : vector<256xf32> to vector<1x256xf32>
    %11 = arith.mulf %7, %10 : vector<1x256xf32>
    %cst_5 = arith.constant 1.000000e-16 : f32
    %12 = vector.broadcast %cst_5 : f32 to vector<1x256xf32>
    %13 = arith.maximumf %11, %12 : vector<1x256xf32>
    %14 = math.rsqrt %13 : vector<1x256xf32>
    %15 = arith.mulf %4, %14 : vector<1x256xf32>
    %cst_6 = arith.constant 1.000000e+00 : f32
    %16 = vector.broadcast %cst_6 : f32 to vector<1x256xf32>
    %17 = arith.subf %15, %16 : vector<1x256xf32>
    %18 = arith.mulf %17, %17 : vector<1x256xf32>
    %cst_7 = arith.constant 1.000000e+03 : f32
    %19 = vector.broadcast %cst_7 : f32 to vector<1x256xf32>
    %20 = arith.mulf %18, %19 : vector<1x256xf32>
    %c0_8 = arith.constant 0 : index
    %c0_9 = arith.constant 0 : index
    %21 = vector.load %arg3[%c0_8, %c0_9] : memref<1x256xf32, #tpu.memory_space<vmem>>, vector<1x256xf32>
    tpu.vector_store %arg3[%c0_8, %c0_9], %20 {strides = array<i32>} : memref<1x256xf32, #tpu.memory_space<vmem>>, vector<1x256xf32>,
    return
  }
  func.func @transform_0(%arg0: i32) -> (i32, i32) {
    %c0_i32 = arith.constant 0 : i32
    %c0_i32_0 = arith.constant 0 : i32
    return %c0_i32, %arg0 : i32, i32
  }
  func.func @transform_1(%arg0: i32) -> (i32, i32) {
    %c0_i32 = arith.constant 0 : i32
    %c0_i32_0 = arith.constant 0 : i32
    return %c0_i32, %arg0 : i32, i32
  }
  func.func @transform_2(%arg0: i32) -> (i32, i32) {
    %c0_i32 = arith.constant 0 : i32
    %c0_i32_0 = arith.constant 0 : i32
    return %c0_i32, %arg0 : i32, i32
  }
}

</mosaic_0001>

<bundles_post_ra>
// kernel: tpu_custom_call.1
= control target key start
LH: loop header
LB: loop body
LE: loop exit
PB: predicated region body
PF: predicated region fallthrough
CT: control target
= control target key end

     0   :  { %7 = vsyncpa [#allocation3], 0  ;;  %s256_s0 = inlined_call_operand.hbm [shape: f32[3,256], index: 0, kind: input, shape index: {}]   ;;  %s257_s1 = inlined_call_operand.hbm [shape: f32[3,256], index: 1, kind: input, shape index: {}]   ;;  %s258_s2 = inlined_call_operand.hbm [shape: f32[1,256], index: 2, kind: output, shape index: {}]  }
   0x1   :  { %8 = vsyncpa [#allocation6], 0 }
   0x2   :  { %9 = vsyncpa [#allocation4], 0  ;;  %s222_s9 = smov [#allocation2]   ;;  %s223_s11 = smov [#allocation5]  }
   0x3   :  { %s16_s10 = sshll.u32 %s222_s9, 4  ;;  %s26_s12 = sshll.u32 %s223_s11, 4  ;;  %s17_s10 = int_to_ptr.vmem [resolvable:$true] %s16_s10  ;;  %s27_s12 = int_to_ptr.vmem [resolvable:$true] %s26_s12 }
   0x4   :  { %s164_s13 = scalar_lea.vmem %s17_s10, 128  ;;  %p169_p1 = scmp.lt.s32.totalorder %s17_s10, %s17_s10 }
   0x5   :  { %p165_p0 = scmp.ne.s32.totalorder %s17_s10, %s164_s13  ;;  %p170_p2 = scmp.lt.s32.totalorder %s164_s13, %s164_s13 }
   0x7   :  { %p171_p3 = por %p170_p2, %p169_p1 }
   0x9   :  { %p172_p4 = pnand %p171_p3, %p165_p0 }
   0xb   :  { %175 = shalt.err (!%p172_p4)
}
   0xc   :  { %19 = dma.hbm_to_vmem [thread:$0]  %s256_s0, 128, %s17_s10, [#allocation3]  }
   0xd   :  { %s184_s16 = scalar_lea.vmem %s27_s12, 128  ;;  %p189_p6 = scmp.lt.s32.totalorder %s27_s12, %s27_s12 }
   0xe   :  { %p185_p5 = scmp.ne.s32.totalorder %s27_s12, %s184_s16  ;;  %p190_p7 = scmp.lt.s32.totalorder %s184_s16, %s184_s16 }
  0x10   :  { %p191_p8 = por %p190_p7, %p189_p6 }
  0x12   :  { %p192_p9 = pnand %p191_p8, %p185_p5 }
  0x14   :  { %195 = shalt.err (!%p192_p9)
}
  0x15   :  { %29 = dma.hbm_to_vmem [thread:$0]  %s257_s1, 128, %s27_s12, [#allocation6]  }
  0x16   :  { %216 = dma.done.wait [#allocation3], 128  }
  0x17   :  { %217 = vsyncadd [#allocation3], 4294967168 }
  0x18   :  { %218 = dma.done.wait [#allocation6], 128  }
  0x19   :  { %219 = vsyncadd [#allocation6], 4294967168  ;;  %v36_v0 = vld [vmem:[#allocation2] sm:$0x77]  ;;  %v37_v1 = vld [vmem:[#allocation5] sm:$0x77]  ;;  %v113_v59 = vlaneseq }
  0x1a   :  { %vm42_vm0 = vcmask 1042432   ;;  %v57_v2 = vmul.f32 %v36_v0, %v36_v0  ;;  %v75_v3 = vmul.f32 %v37_v1, %v37_v1  ;;  %v38_v6 = vmul.f32 %v37_v1, %v36_v0  ;;  %s225_s0 = smov [#allocation7]  }
  0x1b   :  { %v224_v57 = vmov 1966171168   ;;  %v114_v1 = vshrl.u32 %v113_v59, 7  ;;  %s136_s1 = sshll.u32 %s225_s0, 4  ;;  %vm127_vm1 = vcmp.lt.s32.totalorder %v113_v59, 256  ;;  %s137_s1 = int_to_ptr.vmem [resolvable:$true] %s136_s1 }
  0x1c   :  { %v59_v4 = vcombine.high %v57_v2, %v57_v2  ;;  %v61_v5 = vsel %vm42_vm0, %v57_v2, 0.0  ;;  %v77_v8 = vcombine.high %v75_v3, %v75_v3  ;;  %v79_v9 = vsel %vm42_vm0, %v75_v3, 0.0  ;;  %s196_s19 = scalar_lea.vmem %s137_s1, 32  ;;  %p201_p11 = scmp.lt.s32.totalorder %s137_s1, %s137_s1 }
  0x1d   :  { %v62_v7 = vrot.slane %v61_v5, 4  ;;  %v80_v11 = vrot.slane %v79_v9, 4  ;;  %v40_v16 = vcombine.high %v38_v6, %v38_v6  ;;  %v43_v17 = vsel %vm42_vm0, %v38_v6, 0.0  ;;  %p197_p10 = scmp.ne.s32.totalorder %s137_s1, %s196_s19  ;;  %p202_p12 = scmp.lt.s32.totalorder %s196_s19, %s196_s19 }
  0x1e   :  { %v68_v10 = vsel %vm42_vm0, %v59_v4, 0.0  ;;  %v86_v15 = vsel %vm42_vm0, %v77_v8, 0.0  ;;  %v44_v24 = vrot.slane %v43_v17, 4  ;;  %v111_v58 = vunpack.c.l.s4 %v224_v57 }
  0x1f   :  { %v63_v12 = vadd.f32 %v62_v7, %v61_v5  ;;  %v69_v13 = vrot.slane %v68_v10, 4  ;;  %v81_v14 = vadd.f32 %v80_v11, %v79_v9  ;;  %v87_v21 = vrot.slane %v86_v15, 4  ;;  %p203_p13 = por %p202_p12, %p201_p11 }
  0x20   :  { %v50_v27 = vsel %vm42_vm0, %v40_v16, 0.0  ;;  %v45_v34 = vadd.f32 %v44_v24, %v43_v17  ;;  %v112_v0 = vunpack.c.0.s8 %v111_v58 }
  0x21   :  { %v64_v18 = vrot.slane %v63_v12, 2  ;;  %v70_v19 = vadd.f32 %v69_v13, %v68_v10  ;;  %v82_v20 = vrot.slane %v81_v14, 2  ;;  %v88_v26 = vadd.f32 %v87_v21, %v86_v15  ;;  %p204_p0 = pnand %p203_p13, %p197_p10 }
  0x22   :  { %v51_v35 = vrot.slane %v50_v27, 4  ;;  %v46_v41 = vrot.slane %v45_v34, 2  ;;  %v115_v5 = vsub.s32 %v112_v0, %v114_v1 }
  0x23   :  { %v65_v22 = vadd.f32 %v64_v18, %v63_v12  ;;  %v71_v23 = vrot.slane %v70_v19, 2  ;;  %v83_v25 = vadd.f32 %v82_v20, %v81_v14  ;;  %v89_v31 = vrot.slane %v88_v26, 2 }
  0x24   :  { %v52_v42 = vadd.f32 %v51_v35, %v50_v27  ;;  %v47_v46 = vadd.f32 %v46_v41, %v45_v34 }
  0x25   :  { %v66_v28 = vrot.slane %v65_v22, 1  ;;  %v72_v29 = vadd.f32 %v71_v23, %v70_v19  ;;  %v84_v30 = vrot.slane %v83_v25, 1  ;;  %v90_v37 = vadd.f32 %v89_v31, %v88_v26 }
  0x26   :  { %v53_v47 = vrot.slane %v52_v42, 2  ;;  %v48_v49 = vrot.slane %v47_v46, 1 }
  0x27   :  { %v67_v32 = vadd.f32 %v66_v28, %v65_v22  ;;  %v73_v33 = vrot.slane %v72_v29, 1  ;;  %v85_v36 = vadd.f32 %v84_v30, %v83_v25  ;;  %v91_v39 = vrot.slane %v90_v37, 1 }
  0x28   :  { %v54_v50 = vadd.f32 %v53_v47, %v52_v42  ;;  %v49_v51 = vadd.f32 %v48_v49, %v47_v46 }
  0x29   :  { %v74_v38 = vadd.f32 %v73_v33, %v72_v29  ;;  %v93_v40 = vmul.f32 %v85_v36, %v67_v32  ;;  %v92_v43 = vadd.f32 %v91_v39, %v90_v37 }
  0x2a   :  { %v55_v52 = vrot.slane %v54_v50, 1 }
  0x2b   :  { %v95_v44 = vmax.f32 %v93_v40, 1e-16  ;;  %v94_v45 = vmul.f32 %v92_v43, %v74_v38 }
  0x2c   :  { %v56_v54 = vadd.f32 %v55_v52, %v54_v50 }
  0x2d   :  { %152 = vrsqrt.f32 %v95_v44  ;;  %v96_v48 = vmax.f32 %v94_v45, 1e-16 }
  0x2f   :  { %154 = vrsqrt.f32 %v96_v48 }
  0x3a   :  { %v153_v53 = vpop.eup %152 }
  0x3b   :  { %v99_v55 = vmul.f32 %v153_v53, %v49_v51 }
  0x3c   :  { %v155_v60 = vpop.eup %154 }
  0x3d   :  { %v146_v56 = vadd.f32 -1.0, %v99_v55  ;;  %v100_v61 = vmul.f32 %v155_v60, %v56_v54 }
  0x3f   :  { %v103_v62 = vmul.f32 %v146_v56, %v146_v56  ;;  %v147_v63 = vadd.f32 -1.0, %v100_v61 }
  0x41   :  { %v104_v2 = vmul.f32 %v147_v63, %v147_v63  ;;  %v105_v3 = vmul.f32 1000.0, %v103_v62 }
  0x43   :  { %v106_v4 = vmul.f32 1000.0, %v104_v2 }
  0x45   :  { %v109_v6 = vcombine.low %v105_v3, %v106_v4 }
  0x47   :  { %v116_v7 = vrot.slane %v109_v6, %v115_v5 }
  0x49   :  { %v123_v8 = vrot.slane %v116_v7, %v115_v5 }
  0x4b   :  { %129 = vst.msk [vmem:[#allocation7] sm:$0x3] %vm127_vm1, %v123_v8 }
  0x4c   :  { %207 = shalt.err (!%p204_p0)
}
  0x4d   :  { %139 = dma.vmem_to_hbm [thread:$0]  %s137_s1, 32, %s258_s2, [#allocation4]  }
  0x4e   :  { %220 = dma.done.wait [#allocation4], 32  }
  0x4f   :  { %221 = vsyncadd [#allocation4], 4294967264 }
  0x50   :  { %143 = vsyncpa [#allocation3], 1 }
  0x51   :  { %144 = vsyncpa [#allocation6], 1 }
  0x52   :  { %145 = vsyncpa [#allocation4], 1 }

</bundles_post_ra>
